<compile_context>
chip_gen: v7x
topology: tpu7x:2x2x1
jax: 0.10.0
libtpu: 0.0.40
codegen_flags: <defaults>
</compile_context>

<pallas_src>
import jax
import jax.numpy as jnp
from jax.experimental import pallas as pl
from jax.experimental.pallas import tpu as pltpu


# ------------------------------ helpers ------------------------------------ #

def _round_up(x, m):
    return ((x + m - 1) // m) * m


def _round_down(x, m):
    return (x // m) * m


def _pick_tile(size, align, max_tile):
    """Largest tile (multiple of `align`, <= max_tile) with minimal padding.

    Returns (tile, padded_size) with padded_size % tile == 0.  Preference order:
    zero-waste tiles (largest first), otherwise the tile minimizing overshoot.
    """
    size_al = _round_up(size, align)
    if size_al <= max_tile:
        return size_al, size_al                     # single block, no overshoot
    best_t, best_pad = align, _round_up(size_al, align)
    t = max(align, _round_down(max_tile, align))
    while t >= align:
        pad = _round_up(size_al, t)
        if pad == size_al:                          # zero waste, largest such t
            return t, pad
        if pad < best_pad:
            best_t, best_pad = t, pad
        t -= align
    return best_t, best_pad


def _pad2(a, rows, cols):
    r, c = a.shape
    if (r, c) == (rows, cols):
        return a
    return jnp.pad(a, ((0, rows - r), (0, cols - c)))


# ------------------------------ kernels ------------------------------------ #

def _linear_kernel(x_ref, wt_ref, o_ref):
    # x_ref: (TM, K), wt_ref: (K, TN), o_ref: (TM, TN).  Single MXU matmul,
    # f32 accumulation, no scratch / no K loop.
    o_ref[...] = jnp.dot(
        x_ref[...], wt_ref[...], preferred_element_type=jnp.float32
    ).astype(o_ref.dtype)


def _linear_bias_kernel(x_ref, wt_ref, b_ref, o_ref):
    # Same, plus a (1, TN) bias broadcast-add.
    acc = jnp.dot(x_ref[...], wt_ref[...], preferred_element_type=jnp.float32)
    o_ref[...] = (acc + b_ref[...].astype(jnp.float32)).astype(o_ref.dtype)


def _linear_acc_kernel(x_ref, wt_ref, o_ref):
    # K-loop fallback (only for very large IN): accumulate directly into the
    # resident output block -- no scratch accumulator, no epilogue copy.
    @pl.when(pl.program_id(2) == 0)
    def _():
        o_ref[...] = jnp.zeros_like(o_ref)

    o_ref[...] += jnp.dot(
        x_ref[...], wt_ref[...], preferred_element_type=jnp.float32
    ).astype(o_ref.dtype)


def _linear_acc_bias_kernel(x_ref, wt_ref, b_ref, o_ref):
    @pl.when(pl.program_id(2) == 0)
    def _():
        o_ref[...] = jnp.zeros_like(o_ref)

    o_ref[...] += jnp.dot(
        x_ref[...], wt_ref[...], preferred_element_type=jnp.float32
    ).astype(o_ref.dtype)

    @pl.when(pl.program_id(2) == pl.num_programs(2) - 1)
    def _():
        o_ref[...] += b_ref[...].astype(o_ref.dtype)


# ------------------------------ wrapper ------------------------------------ #

def mutiloss_final_layer(
    x,
    weight_t,
    out_features=None,
    bias=None,
    *,
    max_tm=512,
    max_tn=512,
    max_tk=1024,
    vmem_budget_bytes=48 * 1024 * 1024,   # safe on v7x (64 MiB physical)
    fast_path_bytes=2 * 1024 * 1024,
):
    """Forward pass: x @ weight.T (+ bias).

    x:            (B, IN) float32 (cast to weight_t.dtype to feed the MXU).
    weight_t:     (K_pad, N_pad) weight.T zero-padded to 128 multiples, as
                  produced ONCE by make_params (unpadded (IN, OUT) also works).
    out_features: logical OUT (defaults to weight_t.shape[1]).
    bias:         (OUT,) or None.  The module's bias is zeros, so None is exact
                  and skips the bias DMA stream + VPU add entirely.
    returns:      (B, OUT) in x's original dtype.
    """
    B, IN = x.shape
    K_w, N_w = weight_t.shape
    assert K_w >= IN, (K_w, IN)
    OUT = int(out_features) if out_features is not None else N_w
    assert OUT <= N_w, (OUT, N_w)

    out_dtype = x.dtype
    # Feed the MXU in the (frozen) weight dtype; accumulation is always f32.
    if x.dtype != weight_t.dtype:
        x = x.astype(weight_t.dtype)

    x_it = jnp.dtype(x.dtype).itemsize
    w_it = jnp.dtype(weight_t.dtype).itemsize
    o_it = jnp.dtype(out_dtype).itemsize

    K_pad = _round_up(K_w, 128)          # weight rows beyond IN are zero
    N_pad_min = _round_up(N_w, 128)      # lane-dense output columns
    B_al = _round_up(B, 8)

    bias2 = None
    if bias is not None:
        bias2 = bias.reshape(1, -1).astype(jnp.float32)

    # ---- small-problem fast path: whole arrays in VMEM, no grid ----------- #
    single_bytes = (B_al * K_pad * x_it + K_pad * N_pad_min * w_it
                    + B_al * N_pad_min * o_it)
    if single_bytes <= fast_path_bytes:
        xp = _pad2(x, B_al, K_pad)
        wp = _pad2(weight_t, K_pad, N_pad_min)
        vspec = pl.BlockSpec(memory_space=pltpu.MemorySpace.VMEM)
        if bias2 is None:
            kernel, args, in_specs = _linear_kernel, (xp, wp), [vspec, vspec]
        else:
            bp = _pad2(bias2, 1, N_pad_min)
            kernel, args, in_specs = (
                _linear_bias_kernel, (xp, wp, bp), [vspec, vspec, vspec])
        out = pl.pallas_call(
            kernel,
            out_shape=jax.ShapeDtypeStruct((B_al, N_pad_min), out_dtype),
            in_specs=in_specs,
            out_specs=vspec,
        )(*args)
        return out[:B, :OUT]

    # ---- tiled path -------------------------------------------------------- #
    TM, B_pad = _pick_tile(B, 8, max_tm)
    TN, N_pad = _pick_tile(N_pad_min, 128, max_tn)

    def vmem_need(tk):
        # double-buffered x / weight / output tiles
        return 2 * (TM * tk * x_it + tk * TN * w_it + TM * TN * o_it)

    use_k_grid = vmem_need(K_pad) > vmem_budget_bytes
    if not use_k_grid:
        TK = K_pad
        K_total = K_pad
    else:
        TK = max(128, _round_down(max_tk, 128))
        while TK > 128 and vmem_need(TK) > vmem_budget_bytes:
            TK = max(128, _round_down(TK // 2, 128))
        K_total = _round_up(K_pad, TK)

    xp = _pad2(x, B_pad, K_total)
    wp = _pad2(weight_t, K_total, N_pad)
    if bias2 is not None:
        bias2 = _pad2(bias2, 1, N_pad)

    if not use_k_grid:
        # K resident: no K axis, no accumulator, x tile (block (i, 0)) stays
        # resident across the whole N axis.
        grid = (B_pad // TM, N_pad // TN)
        x_spec = pl.BlockSpec((TM, K_total), lambda i, j: (i, 0))
        w_spec = pl.BlockSpec((K_total, TN), lambda i, j: (0, j))
        b_spec = pl.BlockSpec((1, TN), lambda i, j: (0, j))
        out_spec = pl.BlockSpec((TM, TN), lambda i, j: (i, j))
        dims = ("parallel", "parallel")
        kernel = _linear_kernel if bias2 is None else _linear_bias_kernel
    else:
        # Fallback for IN too large for VMEM: K-loop, accumulate into o_ref.
        grid = (B_pad // TM, N_pad // TN, K_total // TK)
        x_spec = pl.BlockSpec((TM, TK), lambda i, j, k: (i, k))
        w_spec = pl.BlockSpec((TK, TN), lambda i, j, k: (k, j))
        b_spec = pl.BlockSpec((1, TN), lambda i, j, k: (0, j))
        out_spec = pl.BlockSpec((TM, TN), lambda i, j, k: (i, j))
        dims = ("parallel", "parallel", "arbitrary")
        kernel = _linear_acc_kernel if bias2 is None else _linear_acc_bias_kernel

    in_specs = [x_spec, w_spec]
    args = [xp, wp]
    if bias2 is not None:
        in_specs.append(b_spec)
        args.append(bias2)

    out = pl.pallas_call(
        kernel,
        out_shape=jax.ShapeDtypeStruct((B_pad, N_pad), out_dtype),
        grid=grid,
        in_specs=in_specs,
        out_specs=out_spec,
        compiler_params=pltpu.CompilerParams(
            dimension_semantics=dims,
            vmem_limit_bytes=int(vmem_budget_bytes),
        ),
    )(*args)

    return out[:B, :OUT]


def make_params(in_features, out_features, layer_mask, dtype=jnp.float32):
    """Replicates reset_parameters(): weight = ones * layer_mask, bias = zeros.

    The frozen weight is transposed AND zero-padded to (round_up(IN,128),
    round_up(OUT,128)) once here, so the forward path never re-pads or
    re-transposes the dominant operand.  `dtype=bfloat16` is lossless for the
    0/1 mask and halves the weight HBM stream (f32 accumulation in-kernel).
    """
    mask = jnp.asarray(layer_mask, dtype=jnp.float32)
    weight = jnp.ones((out_features, in_features), jnp.float32) * mask
    k_pad = _round_up(in_features, 128)
    n_pad = _round_up(out_features, 128)
    weight_t = jnp.pad(
        weight.T, ((0, k_pad - in_features), (0, n_pad - out_features))
    ).astype(dtype)
    bias = jnp.zeros((out_features,), jnp.float32)
    return weight, weight_t, bias


# -------------------------------- test -------------------------------------- #

if __name__ == "__main__":
    key = jax.random.PRNGKey(0)

    def run_case(batch, in_features, out_features, k, dtype=jnp.float32,
                 with_bias=False):
        kx, km = jax.random.split(k)
        x = jax.random.normal(kx, (batch, in_features), jnp.float32)
        layer_mask = (
            jax.random.uniform(km, (out_features, in_features)) > 0.5
        ).astype(jnp.float32)
        weight, weight_t, bias = make_params(
            in_features, out_features, layer_mask, dtype=dtype)
        y = mutiloss_final_layer(
            x, weight_t, out_features, bias if with_bias else None)
        y = jax.block_until_ready(y)
        y_ref = x @ weight.T + bias
        return y, y_ref

    k1, k2, k3, k4, k5 = jax.random.split(key, 5)

    # 1) tiny shape -> grid-free fast path (typical size for this module)
    y, y_ref = run_case(8, 32, 16, k1)
    assert y.shape == (8, 16)
    assert jnp.allclose(y, y_ref, atol=1e-4, rtol=1e-4)

    # 2) tiny shape with explicit (zero) bias -> bias kernel variant
    y, y_ref = run_case(8, 32, 16, k2, with_bias=True)
    assert jnp.allclose(y, y_ref, atol=1e-4, rtol=1e-4)

    # 3) medium shape -> tiled (M, N) grid path, >=2 parallel M blocks
    y, y_ref = run_case(640, 384, 512, k3)
    assert y.shape == (640, 512)
    assert jnp.allclose(y, y_ref, atol=2e-3, rtol=2e-3)

    # 4) medium shape with bias -> bias BlockSpec in the tiled path
    y, y_ref = run_case(640, 384, 512, k4, with_bias=True)
    assert jnp.allclose(y, y_ref, atol=2e-3, rtol=2e-3)

    # 5) bf16 weight storage (0/1 mask exact; x rounded to bf16) -> loose tol
    y, y_ref = run_case(8, 32, 16, k5, dtype=jnp.bfloat16)
    assert jnp.allclose(y, y_ref, atol=5e-2, rtol=5e-2)

    print("KERNEL_OK")
</pallas_src>

<mosaic_0001>
module attributes {stable_mosaic.version = 11 : i64} {
  func.func @_linear_kernel(%arg0: memref<8x128xf32, #tpu.memory_space<vmem>>, %arg1: memref<128x128xf32, #tpu.memory_space<vmem>>, %arg2: memref<8x128xf32, #tpu.memory_space<vmem>>) attributes {dimension_semantics = [], scalar_prefetch = 0 : i64, scratch_operands = 0 : i64, tpu.core_type = #tpu.core_type<tc>} {
    %c0 = arith.constant 0 : index
    %c0_0 = arith.constant 0 : index
    %0 = vector.load %arg0[%c0, %c0_0] : memref<8x128xf32, #tpu.memory_space<vmem>>, vector<8x128xf32>
    %c0_1 = arith.constant 0 : index
    %c0_2 = arith.constant 0 : index
    %1 = vector.load %arg1[%c0_1, %c0_2] : memref<128x128xf32, #tpu.memory_space<vmem>>, vector<128x128xf32>
    %cst = arith.constant dense<0.000000e+00> : vector<8x128xf32>
    %2 = tpu.matmul %0, %1, %cst {dimension_numbers = #tpu.dot_dimension_numbers<[1], [0], [0], [1], [0, 0, 1, 1], [], []>} : vector<8x128xf32>, vector<128x128xf32>, vector<8x128xf32> -> vector<8x128xf32>
    %c0_3 = arith.constant 0 : index
    %c0_4 = arith.constant 0 : index
    %3 = vector.load %arg2[%c0_3, %c0_4] : memref<8x128xf32, #tpu.memory_space<vmem>>, vector<8x128xf32>
    tpu.vector_store %arg2[%c0_3, %c0_4], %2 {strides = array<i32>} : memref<8x128xf32, #tpu.memory_space<vmem>>, vector<8x128xf32>,
    return
  }
}

</mosaic_0001>

<bundles_post_ra>
// kernel: tpu_custom_call.1
= control target key start
LH: loop header
LB: loop body
LE: loop exit
PB: predicated region body
PF: predicated region fallthrough
CT: control target
= control target key end

     0   :  { %7 = vsyncpa [#allocation3], 0  ;;  %s364_s0 = inlined_call_operand.hbm [shape: f32[8,128], index: 0, kind: input, shape index: {}]   ;;  %s365_s1 = inlined_call_operand.hbm [shape: f32[128,128], index: 1, kind: input, shape index: {}]   ;;  %s366_s2 = inlined_call_operand.hbm [shape: f32[8,128], index: 2, kind: output, shape index: {}]  }
   0x1   :  { %8 = vsyncpa [#allocation6], 0 }
   0x2   :  { %9 = vsyncpa [#allocation4], 0  ;;  %s298_s9 = smov [#allocation2]   ;;  %s299_s11 = smov [#allocation5]  }
   0x3   :  { %s16_s10 = sshll.u32 %s298_s9, 4  ;;  %s25_s12 = sshll.u32 %s299_s11, 4  ;;  %s17_s10 = int_to_ptr.vmem [resolvable:$true] %s16_s10  ;;  %s321_s12 = int_to_ptr.vmem [resolvable:$true] %s25_s12 }
   0x4   :  { %s226_s15 = scalar_lea.hbm %s364_s0, 128 }
   0x5   :  { %p227_p0 = scmp.ne.s32.totalorder %s364_s0, %s226_s15  ;;  %p230_p1 = scmp.lt.u32.totalorder %s226_s15, %s364_s0 }
   0x7   :  { %p232_p2 = pnand %p230_p1, %p227_p0 }
   0x9   :  { %235 = shalt.err (!%p232_p2)
}
   0xa   :  { %s236_s20 = scalar_lea.vmem %s17_s10, 128  ;;  %p241_p4 = scmp.lt.s32.totalorder %s17_s10, %s17_s10 }
   0xb   :  { %p237_p3 = scmp.ne.s32.totalorder %s17_s10, %s236_s20  ;;  %p242_p5 = scmp.lt.s32.totalorder %s236_s20, %s236_s20 }
   0xd   :  { %p243_p6 = por %p242_p5, %p241_p4 }
   0xf   :  { %p244_p7 = pnand %p243_p6, %p237_p3 }
  0x11   :  { %247 = shalt.err (!%p244_p7)
}
  0x12   :  { %19 = dma.hbm_to_vmem [thread:$0]  %s364_s0, 128, %s17_s10, [#allocation3]  }
  0x13   :  { %s248_s25 = scalar_lea.hbm %s365_s1, 2048 }
  0x14   :  { %p249_p8 = scmp.ne.s32.totalorder %s365_s1, %s248_s25  ;;  %p252_p9 = scmp.lt.u32.totalorder %s248_s25, %s365_s1 }
  0x16   :  { %p254_p10 = pnand %p252_p9, %p249_p8 }
  0x18   :  { %257 = shalt.err (!%p254_p10)
}
  0x19   :  { %s258_s30 = scalar_lea.vmem %s321_s12, 2048  ;;  %p263_p12 = scmp.lt.s32.totalorder %s321_s12, %s321_s12 }
  0x1a   :  { %p259_p11 = scmp.ne.s32.totalorder %s321_s12, %s258_s30  ;;  %p264_p13 = scmp.lt.s32.totalorder %s258_s30, %s258_s30 }
  0x1c   :  { %p265_p0 = por %p264_p13, %p263_p12 }
  0x1e   :  { %p266_p1 = pnand %p265_p0, %p259_p11 }
  0x20   :  { %269 = shalt.err (!%p266_p1)
}
  0x21   :  { %s300_s0 = smov 128   ;;  %s301_s3 = smov 8  }
  0x22   :  { %31 = dma.hbm_to_vmem [thread:$0]  %s365_s1, 2048, %s321_s12, [#allocation6], %s300_s0, %s300_s0, %s301_s3  }
  0x23   :  { %292 = dma.done.wait [#allocation3], 128  }
  0x24   :  { %293 = vsyncadd [#allocation3], 4294967168 }
  0x25   :  { %294 = dma.done.wait [#allocation6], 2048  }
  0x26   :  { %295 = vsyncadd [#allocation6], 4294965248  ;;  %v302_v0 = vmov 0.0|0.0   ;;  %vm303_vm0 = vmmov 0   ;;  %v304_v1 = vmov 0.0   ;;  %v39_v2 = vld [vmem:[#allocation5] sm:$0xff] }
  0x27   :  { %194 = vmatprep.subr.bf16.mxu0 %v302_v0  ;;  %191 = vmatprep.mubr.msk.f32.mxu0 %vm303_vm0, %v304_v1  ;;  %v40_v3 = vld [vmem:[#allocation5 + $0x8] sm:$0xff]  ;;  %v41_v4 = vld [vmem:[#allocation5 + $0x10] sm:$0xff]  ;;  %v42_v6 = vld [vmem:[#allocation5 + $0x18] sm:$0xff]  ;;  %s305_s1 = smov [#allocation7]  }
  0x28   :  { %v195_v5 = vpack.c.bf16 %v40_v3, %v39_v2  ;;  %v198_v7 = vpack.c.bf16 %v42_v6, %v41_v4  ;;  %v43_v8 = vld [vmem:[#allocation5 + $0x20] sm:$0xff]  ;;  %v44_v9 = vld [vmem:[#allocation5 + $0x28] sm:$0xff]  ;;  %v45_v11 = vld [vmem:[#allocation5 + $0x30] sm:$0xff]  ;;  %s132_s6 = sshll.u32 %s305_s1, 4  ;;  %s133_s6 = int_to_ptr.vmem [resolvable:$true] %s132_s6 }
  0x29   :  { %v201_v10 = vpack.c.bf16 %v44_v9, %v43_v8  ;;  %v46_v12 = vld [vmem:[#allocation5 + $0x38] sm:$0xff]  ;;  %v47_v14 = vld [vmem:[#allocation5 + $0x40] sm:$0xff]  ;;  %v48_v15 = vld [vmem:[#allocation5 + $0x48] sm:$0xff]  ;;  %s270_s7 = scalar_lea.vmem %s133_s6, 128  ;;  %p275_p3 = scmp.lt.s32.totalorder %s133_s6, %s133_s6 }
  0x2a   :  { %196 = vmatpush3.bf16.msra.mxu0 %v195_v5  ;;  %v204_v13 = vpack.c.bf16 %v46_v12, %v45_v11  ;;  %v207_v16 = vpack.c.bf16 %v48_v15, %v47_v14  ;;  %v49_v17 = vld [vmem:[#allocation5 + $0x50] sm:$0xff]  ;;  %v50_v18 = vld [vmem:[#allocation5 + $0x58] sm:$0xff]  ;;  %v51_v20 = vld [vmem:[#allocation5 + $0x60] sm:$0xff]  ;;  %p271_p2 = scmp.ne.s32.totalorder %s133_s6, %s270_s7  ;;  %p276_p4 = scmp.lt.s32.totalorder %s270_s7, %s270_s7 }
  0x2b   :  { %197 = vmatprep.subr.bf16.mxu0 %v302_v0  ;;  %v210_v19 = vpack.c.bf16 %v50_v18, %v49_v17  ;;  %v52_v21 = vld [vmem:[#allocation5 + $0x68] sm:$0xff]  ;;  %v53_v23 = vld [vmem:[#allocation5 + $0x70] sm:$0xff]  ;;  %v54_v24 = vld [vmem:[#allocation5 + $0x78] sm:$0xff] }
  0x2c   :  { %v213_v22 = vpack.c.bf16 %v52_v21, %v51_v20  ;;  %v216_v25 = vpack.c.bf16 %v54_v24, %v53_v23  ;;  %v38_v26 = vld [vmem:[#allocation2] sm:$0xff]  ;;  %p277_p5 = por %p276_p4, %p275_p3 }
  0x2e   :  { %199 = vmatpush3.bf16.msra.mxu0 %v198_v7  ;;  %p278_p6 = pnand %p277_p5, %p271_p2 }
  0x2f   :  { %200 = vmatprep.subr.bf16.mxu0 %v302_v0 }
  0x32   :  { %202 = vmatpush3.bf16.msra.mxu0 %v201_v10 }
  0x33   :  { %203 = vmatprep.subr.bf16.mxu0 %v302_v0 }
  0x36   :  { %205 = vmatpush3.bf16.msra.mxu0 %v204_v13 }
  0x37   :  { %206 = vmatprep.subr.bf16.mxu0 %v302_v0 }
  0x3a   :  { %208 = vmatpush3.bf16.msra.mxu0 %v207_v16 }
  0x3b   :  { %209 = vmatprep.subr.bf16.mxu0 %v302_v0 }
  0x3e   :  { %211 = vmatpush3.bf16.msra.mxu0 %v210_v19 }
  0x3f   :  { %212 = vmatprep.subr.bf16.mxu0 %v302_v0 }
  0x42   :  { %214 = vmatpush3.bf16.msra.mxu0 %v213_v22 }
  0x43   :  { %215 = vmatprep.subr.bf16.mxu0 %v302_v0 }
  0x46   :  { %217 = vmatpush3.bf16.msra.mxu0 %v216_v25 }
  0x49   :  { %192 = vmatmul.mubr.f32.vlgmr.msra.gmra.mrb[0].mxu0 %v38_v26 }
 0x11c   :  { %v121_v27 = vpop.f32.mrb[0].mxu0 }
 0x11d   :  { %125 = vst [vmem:[#allocation7] sm:$0xff] %v121_v27  ;;  %v193_v28 = vpop.f32.mrb[1].mxu0 }
 0x11e   :  { %281 = shalt.err (!%p278_p6)
}
 0x11f   :  { %s282_s10 = scalar_lea.hbm %s366_s2, 128 }
 0x120   :  { %p283_p7 = scmp.ne.s32.totalorder %s366_s2, %s282_s10  ;;  %p286_p8 = scmp.lt.u32.totalorder %s282_s10, %s366_s2 }
 0x122   :  { %p288_p9 = pnand %p286_p8, %p283_p7 }
 0x124   :  { %291 = shalt.err (!%p288_p9)
}
 0x125   :  { %135 = dma.vmem_to_hbm [thread:$0]  %s133_s6, 128, %s366_s2, [#allocation4]  }
 0x126   :  { %296 = dma.done.wait [#allocation4], 128  }
 0x127   :  { %297 = vsyncadd [#allocation4], 4294967168 }
 0x128   :  { %139 = vsyncpa [#allocation3], 1 }
 0x129   :  { %140 = vsyncpa [#allocation6], 1 }
 0x12a   :  { %141 = vsyncpa [#allocation4], 1 }

</bundles_post_ra>
